<compile_context>
chip_gen: v7x
topology: tpu7x:2x2x1
jax: 0.10.0
libtpu: 0.0.40
codegen_flags: <defaults>
</compile_context>

<pallas_src>
import functools

import jax
import jax.numpy as jnp
from jax.experimental import pallas as pl
from jax.experimental.pallas import tpu as pltpu


def _round_up(v, m):
    return ((v + m - 1) // m) * m


@functools.lru_cache(maxsize=None)
def _tpu_hw_info():
    """Returns (num_tensorcores_per_chip, vmem_limit_bytes, working_budget)."""
    vmem_cap = 64 * 1024 * 1024          # conservative (v7x-sized) fallback
    try:
        vmem_cap = int(pltpu.get_tpu_info().vmem_capacity_bytes)
    except Exception:
        pass
    kind = ""
    try:
        kind = jax.devices()[0].device_kind.lower()
    except Exception:
        pass
    # v5e / v6e are single-TensorCore chips; v7x (and v4/v5p megacore) have 2.
    single_tc = any(t in kind for t in
                    ("v5e", "v5 lite", "v5lite", "v6e", "v6 lite", "v6lite"))
    num_tc = 1 if single_tc else 2
    vmem_limit = int(vmem_cap * 0.75)    # leave room for Mosaic scratch
    budget = int(vmem_limit * 0.85)      # pipeline working-set budget
    return num_tc, vmem_limit, budget


def _mlp_kernel(x_ref, w1_ref, b1_ref, w2_ref, b2_ref, o_ref, *scratch):
    mxu_dtype = w1_ref.dtype
    # Cast activations to the MXU dtype in-kernel (no extra HBM pass outside).
    x = x_ref[...].astype(mxu_dtype)
    # Layer 1: (tile, d_in_p) @ (d_in_p, hid_p), f32 accumulation on the MXU.
    h = jnp.dot(x, w1_ref[...], preferred_element_type=jnp.float32)
    h = jnp.maximum(h + b1_ref[...], 0.0).astype(mxu_dtype)   # f32 epilogue
    if scratch:
        # Large tiles: stage the intermediate through VMEM to bound vreg
        # pressure.  Small tiles skip this (saves vst/vld slots per step).
        h_ref, = scratch
        h_ref[...] = h
        h = h_ref[...]
    # Layer 2: (tile, hid_p) @ (hid_p, d_out), f32 accumulation on the MXU.
    y = jnp.dot(h, w2_ref[...], preferred_element_type=jnp.float32)
    y = jnp.maximum(y + b2_ref[...], 0.0)
    o_ref[...] = y.astype(o_ref.dtype)


def _choose_tile_n(n, d_in_p, hid_p, d_out, x_itemsize, mxu_itemsize,
                   out_itemsize, requested, num_tc, budget):
    """Pick the batch tile from an explicit, generation-aware VMEM budget."""
    # All blocks whose sublane count is `tile` (x block, out block, h scratch)
    # must satisfy their dtype's sublane multiple -> take the max over them.
    row_mult = 16 if min(x_itemsize, mxu_itemsize, out_itemsize) < 4 else 8
    if requested is None:
        # Weights/biases: grid-invariant index_maps (DMA'd once) but the
        # default pipeline reserves two buffers for them.
        weight_bytes = (2 * (d_in_p * hid_p + hid_p * d_out) * mxu_itemsize
                        + 2 * (hid_p + d_out) * 4)
        per_row = (2 * d_in_p * x_itemsize       # x tile, double buffered
                   + 2 * d_out * out_itemsize    # out tile, double buffered
                   + hid_p * mxu_itemsize)       # h intermediate / scratch
        avail = max(budget - weight_bytes, row_mult * per_row)
        tile = avail // per_row
    else:
        tile = requested
    tile = min(tile, 1024)
    if num_tc > 1 and n > row_mult:
        # Keep >= 2 grid steps so the "parallel" batch axis can shard across
        # both TensorCores (v7x).  Skipped on single-TC v5e/v6e, where it
        # would only add per-step pipeline overhead.
        tile = min(tile, _round_up(pl.cdiv(n, 2), row_mult))
    tile = min(tile, _round_up(n, row_mult))
    tile = max(row_mult, (tile // row_mult) * row_mult)
    return int(tile)


def prepare_mlp_params(var, if_bias, mxu_dtype=jnp.bfloat16):
    """One-time parameter prep. Cache the result; keep OUT of the hot path.

    var (PyTorch layout):
      if_bias=True  -> (W1 (H,Din), b1 (H,), W2 (Dout,H), b2 (Dout,))
      if_bias=False -> (W1 (H,Din), W2 (Dout,H))

    Returns (w1_p, b1_p, w2_p, b2_p): weights transposed to (in, out) in
    `mxu_dtype`, contraction dim padded only to sublane alignment (16),
    hidden dim padded to 128 (on-chip only), output dim UNPADDED, biases f32.
    """
    if if_bias:
        w1, b1, w2, b2 = var
    else:
        w1, w2 = var
        b1 = jnp.zeros((w1.shape[0],), jnp.float32)   # exact: relu(x@W + 0)
        b2 = jnp.zeros((w2.shape[0],), jnp.float32)

    hidden, d_in = w1.shape
    d_out = w2.shape[0]
    d_in_p = _round_up(d_in, 16)        # sublane alignment only (no 128 pad)
    hid_p = _round_up(hidden, 128)      # on-chip lane-dense intermediate

    w1_p = jnp.zeros((d_in_p, hid_p), mxu_dtype).at[:d_in, :hidden].set(
        jnp.transpose(w1).astype(mxu_dtype))
    w2_p = jnp.zeros((hid_p, d_out), mxu_dtype).at[:hidden, :].set(
        jnp.transpose(w2).astype(mxu_dtype))
    b1_p = jnp.zeros((1, hid_p), jnp.float32).at[0, :hidden].set(
        b1.astype(jnp.float32))
    b2_p = b2.astype(jnp.float32).reshape(1, d_out)
    return w1_p, b1_p, w2_p, b2_p


@functools.partial(jax.jit, static_argnames=("tile_n",))
def mlp_forward(x, w1_p, b1_p, w2_p, b2_p, tile_n=None):
    """Hot-path forward on prepared (transposed, sublane-aligned) params."""
    n, d_in = x.shape
    d_in_p, hid_p = w1_p.shape
    d_out = w2_p.shape[1]
    mxu_dtype = w1_p.dtype
    out_dtype = x.dtype
    x_itemsize = jnp.dtype(x.dtype).itemsize
    mxu_itemsize = jnp.dtype(mxu_dtype).itemsize
    out_itemsize = jnp.dtype(out_dtype).itemsize

    num_tc, vmem_limit, budget = _tpu_hw_info()
    tile = _choose_tile_n(n, d_in_p, hid_p, d_out, x_itemsize, mxu_itemsize,
                          out_itemsize, tile_n, num_tc, budget)

    # x only needs its feature dim to match w1's sublane-aligned first dim;
    # for already-aligned d_in (the common GNN case) it is passed straight
    # through with no materialization and no lane padding.
    if d_in != d_in_p:
        x_in = jnp.zeros((n, d_in_p), x.dtype).at[:, :d_in].set(x)
    else:
        x_in = x

    stage_h = tile * hid_p * mxu_itemsize > 128 * 1024
    scratch_shapes = ([pltpu.VMEM((tile, hid_p), mxu_dtype)]
                      if stage_h else [])

    grid = (pl.cdiv(n, tile),)
    x_spec = pl.BlockSpec((tile, d_in_p), lambda i: (i, 0))
    w1_spec = pl.BlockSpec((d_in_p, hid_p), lambda i: (0, 0))
    b1_spec = pl.BlockSpec((1, hid_p), lambda i: (0, 0))
    w2_spec = pl.BlockSpec((hid_p, d_out), lambda i: (0, 0))
    b2_spec = pl.BlockSpec((1, d_out), lambda i: (0, 0))
    # Unpadded output: last dim == full array dim, so the (8,128) rule is
    # satisfied; narrow outputs use masked stores but avoid padded writeback
    # and the post-kernel slice.
    out_spec = pl.BlockSpec((tile, d_out), lambda i: (i, 0))

    flops = 2 * n * (d_in_p * hid_p + hid_p * d_out)
    bytes_accessed = (n * d_in_p * x_itemsize
                      + n * d_out * out_itemsize
                      + (d_in_p * hid_p + hid_p * d_out) * mxu_itemsize
                      + (hid_p + d_out) * 4)

    out = pl.pallas_call(
        _mlp_kernel,
        out_shape=jax.ShapeDtypeStruct((n, d_out), out_dtype),
        grid_spec=pltpu.PrefetchScalarGridSpec(
            num_scalar_prefetch=0,
            grid=grid,
            in_specs=[x_spec, w1_spec, b1_spec, w2_spec, b2_spec],
            out_specs=out_spec,
            scratch_shapes=scratch_shapes,
        ),
        compiler_params=pltpu.CompilerParams(
            dimension_semantics=("parallel",),
            vmem_limit_bytes=int(vmem_limit),
        ),
        cost_estimate=pl.CostEstimate(
            flops=int(flops), transcendentals=0,
            bytes_accessed=int(bytes_accessed)),
    )(x_in, w1_p, b1_p, w2_p, b2_p)
    return out


def mlp_apply(x, var, if_bias, *, mxu_dtype=jnp.bfloat16, tile_n=None):
    """One-shot convenience mirroring MLP.forward(x, var, if_bias).

    For repeated calls, run prepare_mlp_params ONCE, cache the result, and
    call mlp_forward directly (so the hot path is a single pallas_call).
    bf16 MXU inputs (default) are the v5e/v6e/v7x fast path; mxu_dtype=f32
    matches the PyTorch module numerically.
    """
    params = prepare_mlp_params(var, if_bias, mxu_dtype)
    return mlp_forward(x, *params, tile_n=tile_n)


def _reference(x, var, if_bias):
    """Pure-JAX reference mirroring the PyTorch forward exactly (f32)."""
    if if_bias:
        w1, b1, w2, b2 = var
        x = jax.nn.relu(x @ w1.T + b1)
        x = jax.nn.relu(x @ w2.T + b2)
    else:
        w1, w2 = var
        x = jax.nn.relu(x @ w1.T)
        x = jax.nn.relu(x @ w2.T)
    return x


if __name__ == "__main__":
    key = jax.random.PRNGKey(0)
    kx, kw1, kb1, kw2, kb2 = jax.random.split(key, 5)

    # Small GNN-style shapes: (batch, in) -> hidden -> out.  N is not a
    # multiple of the tile so the ragged-tail masking path is exercised.
    N, D_IN, HIDDEN, D_OUT = 200, 16, 32, 16

    x = jax.random.normal(kx, (N, D_IN), dtype=jnp.float32)
    # PyTorch layout: (out_features, in_features).
    w1 = jax.random.normal(kw1, (HIDDEN, D_IN), dtype=jnp.float32) * 0.1
    b1 = jax.random.normal(kb1, (HIDDEN,), dtype=jnp.float32) * 0.1
    w2 = jax.random.normal(kw2, (D_OUT, HIDDEN), dtype=jnp.float32) * 0.1
    b2 = jax.random.normal(kb2, (D_OUT,), dtype=jnp.float32) * 0.1

    var_bias = (w1, b1, w2, b2)
    var_nob = (w1, w2)
    ref_bias = _reference(x, var_bias, True)
    ref_nob = _reference(x, var_nob, False)

    # --- exact f32 MXU path, if_bias=True (cached prep + jitted hot path) ---
    p32 = prepare_mlp_params(var_bias, True, mxu_dtype=jnp.float32)
    out32 = jax.block_until_ready(mlp_forward(x, *p32))
    assert out32.shape == (N, D_OUT)
    assert jnp.allclose(out32, ref_bias, atol=1e-5, rtol=1e-5)

    # --- exact f32 MXU path, if_bias=False ----------------------------------
    p32_nob = prepare_mlp_params(var_nob, False, mxu_dtype=jnp.float32)
    out32_nob = jax.block_until_ready(mlp_forward(x, *p32_nob))
    assert out32_nob.shape == (N, D_OUT)
    assert jnp.allclose(out32_nob, ref_nob, atol=1e-5, rtol=1e-5)

    # --- default bf16 MXU fast path (f32 epilogue), looser tolerance --------
    pbf = prepare_mlp_params(var_bias, True)          # bf16 default
    out_bf = jax.block_until_ready(mlp_forward(x, *pbf))
    assert out_bf.shape == (N, D_OUT)
    assert jnp.allclose(out_bf, ref_bias, atol=5e-2, rtol=5e-2)

    # --- convenience wrapper, no-bias branch, bf16 default -------------------
    out_apply = jax.block_until_ready(mlp_apply(x, var_nob, if_bias=False))
    assert out_apply.shape == (N, D_OUT)
    assert jnp.allclose(out_apply, ref_nob, atol=5e-2, rtol=5e-2)

    print("KERNEL_OK")
</pallas_src>

<mosaic_0001>
module attributes {stable_mosaic.version = 11 : i64} {
  func.func @_mlp_kernel(%arg0: i32, %arg1: memref<104x16xf32, #tpu.memory_space<vmem>>, %arg2: memref<16x128xf32, #tpu.memory_space<vmem>>, %arg3: memref<1x128xf32, #tpu.memory_space<vmem>>, %arg4: memref<128x16xf32, #tpu.memory_space<vmem>>, %arg5: memref<1x16xf32, #tpu.memory_space<vmem>>, %arg6: memref<104x16xf32, #tpu.memory_space<vmem>>) attributes {dimension_semantics = [#tpu.dimension_semantics<parallel>], iteration_bounds = array<i64: 2>, scalar_prefetch = 0 : i64, scratch_operands = 0 : i64, tpu.core_type = #tpu.core_type<tc>, window_params = [{transform_indices = @transform_0, window_bounds = array<i64: 104, 16>}, {pipeline_mode = #tpu.pipeline_mode<synchronous>, transform_indices = @transform_1, window_bounds = array<i64: 16, 128>}, {pipeline_mode = #tpu.pipeline_mode<synchronous>, transform_indices = @transform_2, window_bounds = array<i64: 1, 128>}, {pipeline_mode = #tpu.pipeline_mode<synchronous>, transform_indices = @transform_3, window_bounds = array<i64: 128, 16>}, {pipeline_mode = #tpu.pipeline_mode<synchronous>, transform_indices = @transform_4, window_bounds = array<i64: 1, 16>}, {transform_indices = @transform_5, window_bounds = array<i64: 104, 16>}]} {
    %c0 = arith.constant 0 : index
    %c0_0 = arith.constant 0 : index
    %0 = vector.load %arg1[%c0, %c0_0] : memref<104x16xf32, #tpu.memory_space<vmem>>, vector<104x16xf32>
    %c0_1 = arith.constant 0 : index
    %c0_2 = arith.constant 0 : index
    %1 = vector.load %arg2[%c0_1, %c0_2] : memref<16x128xf32, #tpu.memory_space<vmem>>, vector<16x128xf32>
    %cst = arith.constant dense<0.000000e+00> : vector<104x128xf32>
    %2 = tpu.matmul %0, %1, %cst {dimension_numbers = #tpu.dot_dimension_numbers<[1], [0], [0], [1], [0, 0, 1, 1], [], []>} : vector<104x16xf32>, vector<16x128xf32>, vector<104x128xf32> -> vector<104x128xf32>
    %c0_3 = arith.constant 0 : index
    %c0_4 = arith.constant 0 : index
    %3 = vector.load %arg3[%c0_3, %c0_4] : memref<1x128xf32, #tpu.memory_space<vmem>>, vector<1x128xf32>
    %4 = vector.broadcast %3 : vector<1x128xf32> to vector<104x128xf32>
    %5 = arith.addf %2, %4 : vector<104x128xf32>
    %cst_5 = arith.constant 0.000000e+00 : f32
    %6 = vector.broadcast %cst_5 : f32 to vector<104x128xf32>
    %7 = arith.maximumf %5, %6 : vector<104x128xf32>
    %c0_6 = arith.constant 0 : index
    %c0_7 = arith.constant 0 : index
    %8 = vector.load %arg4[%c0_6, %c0_7] : memref<128x16xf32, #tpu.memory_space<vmem>>, vector<128x16xf32>
    %cst_8 = arith.constant dense<0.000000e+00> : vector<104x16xf32>
    %9 = tpu.matmul %7, %8, %cst_8 {dimension_numbers = #tpu.dot_dimension_numbers<[1], [0], [0], [1], [0, 0, 1, 1], [], []>} : vector<104x128xf32>, vector<128x16xf32>, vector<104x16xf32> -> vector<104x16xf32>
    %c0_9 = arith.constant 0 : index
    %c0_10 = arith.constant 0 : index
    %10 = vector.load %arg5[%c0_9, %c0_10] : memref<1x16xf32, #tpu.memory_space<vmem>>, vector<1x16xf32>
    %11 = vector.broadcast %10 : vector<1x16xf32> to vector<104x16xf32>
    %12 = arith.addf %9, %11 : vector<104x16xf32>
    %cst_11 = arith.constant 0.000000e+00 : f32
    %13 = vector.broadcast %cst_11 : f32 to vector<104x16xf32>
    %14 = arith.maximumf %12, %13 : vector<104x16xf32>
    %c0_12 = arith.constant 0 : index
    %c0_13 = arith.constant 0 : index
    %15 = vector.load %arg6[%c0_12, %c0_13] : memref<104x16xf32, #tpu.memory_space<vmem>>, vector<104x16xf32>
    tpu.vector_store %arg6[%c0_12, %c0_13], %14 {strides = array<i32>} : memref<104x16xf32, #tpu.memory_space<vmem>>, vector<104x16xf32>,
    return
  }
  func.func @transform_0(%arg0: i32) -> (i32, i32) {
    %c0_i32 = arith.constant 0 : i32
    %c0_i32_0 = arith.constant 0 : i32
    return %arg0, %c0_i32 : i32, i32
  }
  func.func @transform_1(%arg0: i32) -> (i32, i32) {
    %c0_i32 = arith.constant 0 : i32
    %c0_i32_0 = arith.constant 0 : i32
    %c0_i32_1 = arith.constant 0 : i32
    return %c0_i32, %c0_i32_0 : i32, i32
  }
  func.func @transform_2(%arg0: i32) -> (i32, i32) {
    %c0_i32 = arith.constant 0 : i32
    %c0_i32_0 = arith.constant 0 : i32
    %c0_i32_1 = arith.constant 0 : i32
    return %c0_i32, %c0_i32_0 : i32, i32
  }
  func.func @transform_3(%arg0: i32) -> (i32, i32) {
    %c0_i32 = arith.constant 0 : i32
    %c0_i32_0 = arith.constant 0 : i32
    %c0_i32_1 = arith.constant 0 : i32
    return %c0_i32, %c0_i32_0 : i32, i32
  }
  func.func @transform_4(%arg0: i32) -> (i32, i32) {
    %c0_i32 = arith.constant 0 : i32
    %c0_i32_0 = arith.constant 0 : i32
    %c0_i32_1 = arith.constant 0 : i32
    return %c0_i32, %c0_i32_0 : i32, i32
  }
  func.func @transform_5(%arg0: i32) -> (i32, i32) {
    %c0_i32 = arith.constant 0 : i32
    %c0_i32_0 = arith.constant 0 : i32
    return %arg0, %c0_i32 : i32, i32
  }
}

</mosaic_0001>

<bundles_post_ra>
// kernel: mlp_forward.1
= control target key start
LH: loop header
LB: loop body
LE: loop exit
PB: predicated region body
PF: predicated region fallthrough
CT: control target
= control target key end

     0   :  { %s1347_s18 = smov 0   ;;  %s1349_s19 = smov 0   ;;  %s1689_s0 = inlined_call_operand.vmem [shape: f32[200,16], index: 0, kind: input, shape index: {}]   ;;  %s1690_s1 = inlined_call_operand.vmem [shape: f32[16,128], index: 1, kind: input, shape index: {}]   ;;  %s1691_s2 = inlined_call_operand.vmem [shape: f32[1,128], index: 2, kind: input, shape index: {}]   ;;  %s1692_s3 = inlined_call_operand.vmem [shape: f32[128,16], index: 3, kind: input, shape index: {}]   ;;  %s1693_s4 = inlined_call_operand.vmem [shape: f32[1,16], index: 4, kind: input, shape index: {}]   ;;  %s1694_s5 = inlined_call_operand.vmem [shape: f32[200,16], index: 5, kind: output, shape index: {}]  }
   0x1   :  { %s1351_s20 = smov 0  }
   0x2 LB: > { %s1360_s21 = sadd.s32 4294967295, %s1280_s20   ;;  %s1362_s22 = sadd.s32 1, %s1280_s20   ;;  %s1280_s20 = sphi %s1351_s20, %s1701_s20   ;;  %s1276_s19 = sphi %s1349_s19, %s1700_s19   ;;  %s1272_s18 = sphi %s1347_s18, %s1699_s18  }
   0x3   : > { %s129_s23 = ssub.s32 %s1280_s20, %s1362_s22  ;;  %s132_s24 = sadd.s32 1, %s1276_s19 }
   0x4   : > { %p130_p0 = scmp.eq.s32.totalorder %s129_s23, 0  ;;  %p142_p1 = scmp.ne.s32.totalorder %s1276_s19, %s1272_s18 }
   0x5   : > { %p143_p2 = scmp.eq.s32.totalorder %s1360_s21, 1  ;;  %p898_p3 = scmp.ge.s32.totalorder %s1280_s20, 1 }
   0x6   : > { %s1370_s25 = scalar_select %p130_p0, %s1276_s19, %s132_s24  }
   0x7   : > { %p1372_p4 = por %p143_p2, %p142_p1  ;;  %p196_p5 = scmp.lt.s32.totalorder %s1280_s20, 3 }
   0x9   : > { %p197_p6 = pnand %p898_p3, %p196_p5 }
   0xa   : > { %v259_v0 = vld [vmem:[%s1690_s1] sm:$0xff] (!%p197_p6)  ;;  %v260_v1 = vld [vmem:[%s1690_s1 + $0x8] sm:$0xff] (!%p197_p6)  ;;  %s1383_s6 = smul.u32 (!%p197_p6), 13, %s1360_s21  ;;  %v1314_v2 = vmov (!%p197_p6), 0.0|0.0   ;;  %vm1315_vm0 = vmmov (!%p197_p6), 0   ;;  %v1316_v4 = vmov (!%p197_p6), 0.0  }
   0xb   : > { %200 = sbr.rel (%p197_p6) target bundleno = 565 (0x235), region = 40  ;;  %1086 = vmatprep.subr.bf16.mxu0 (!%p197_p6), %v1314_v2  ;;  %v1087_v3 = vpack.c.bf16 (!%p197_p6), %v260_v1, %v259_v0  ;;  %976 = vmatprep.mubr.msk.f32.mxu0 (!%p197_p6), %vm1315_vm0, %v1316_v4  ;;  %v451_v5 = vld [vmem:[%s1692_s3] sm:$0xff] (!%p197_p6)  ;;  %v452_v6 = vld [vmem:[%s1692_s3 + $0x8] sm:$0xff] (!%p197_p6)  ;;  %v453_v8 = vld [vmem:[%s1692_s3 + $0x10] sm:$0xff] (!%p197_p6)  ;;  %vm268_vm1 = vcmask (!%p197_p6), 130048  }
   0xc   : > { %p232_p7 = scmp.lt.s32.totalorder (!%p197_p6), %s1383_s6, 24  ;;  %v1090_v7 = vpack.c.bf16 (!%p197_p6), %v452_v6, %v451_v5  ;;  %1113 = vmatprep.subr.bf16.mxu1 (!%p197_p6), %v1314_v2  ;;  %1056 = vmatprep.mubr.msk.f32.mxu1 (!%p197_p6), %vm1315_vm0, %v1316_v4  ;;  %v454_v9 = vld [vmem:[%s1692_s3 + $0x18] sm:$0xff] (!%p197_p6)  ;;  %v455_v11 = vld [vmem:[%s1692_s3 + $0x20] sm:$0xff] (!%p197_p6)  ;;  %v456_v12 = vld [vmem:[%s1692_s3 + $0x28] sm:$0xff] (!%p197_p6) }
   0xd   : > { %1088 = vmatpush3.bf16.msra.mxu0 (!%p197_p6), %v1087_v3  ;;  %v1093_v10 = vpack.c.bf16 (!%p197_p6), %v454_v9, %v453_v8  ;;  %v1096_v15 = vpack.c.bf16 (!%p197_p6), %v456_v12, %v455_v11  ;;  %v457_v16 = vld [vmem:[%s1692_s3 + $0x30] sm:$0xff] (!%p197_p6)  ;;  %v458_v17 = vld [vmem:[%s1692_s3 + $0x38] sm:$0xff] (!%p197_p6)  ;;  %v459_v20 = vld [vmem:[%s1692_s3 + $0x40] sm:$0xff] (!%p197_p6) }
   0xe   : > { %1089 = vmatprep.subr.bf16.mxu0 (!%p197_p6), %v1314_v2  ;;  %1121 = vmatpush3.bf16.msra.mxu1 (!%p197_p6), %v1090_v7  ;;  %v1099_v19 = vpack.c.bf16 (!%p197_p6), %v458_v17, %v457_v16  ;;  %v460_v21 = vld [vmem:[%s1692_s3 + $0x48] sm:$0xff] (!%p197_p6)  ;;  %v461_v24 = vld [vmem:[%s1692_s3 + $0x50] sm:$0xff] (!%p197_p6)  ;;  %v462_v25 = vld [vmem:[%s1692_s3 + $0x58] sm:$0xff] (!%p197_p6) }
   0xf   : > { %1114 = vmatprep.subr.bf16.mxu1 (!%p197_p6), %v1314_v2  ;;  %v1102_v23 = vpack.c.bf16 (!%p197_p6), %v460_v21, %v459_v20  ;;  %v1105_v27 = vpack.c.bf16 (!%p197_p6), %v462_v25, %v461_v24  ;;  %v463_v28 = vld [vmem:[%s1692_s3 + $0x60] sm:$0xff] (!%p197_p6)  ;;  %v464_v29 = vld [vmem:[%s1692_s3 + $0x68] sm:$0xff] (!%p197_p6)  ;;  %v465_v39 = vld [vmem:[%s1692_s3 + $0x70] sm:$0xff] (!%p197_p6) }
  0x10   : > { %v1108_v31 = vpack.c.bf16 (!%p197_p6), %v464_v29, %v463_v28  ;;  %v466_v40 = vld [vmem:[%s1692_s3 + $0x78] sm:$0xff] (!%p197_p6)  ;;  %v1516_v42 = vld [vmem:[%s1691_s2] ss:$0 sm:$0xff] (!%p197_p6) }
  0x11   : > { %v1111_v41 = vpack.c.bf16 (!%p197_p6), %v466_v40, %v465_v39 }
  0x12   : > { %s233_s15 = scalar_select %p232_p7, %s1383_s6, 24  ;;  %1122 = vmatpush3.bf16.msra.mxu1 %v1093_v10 }
  0x13   : > { %1115 = vmatprep.subr.bf16.mxu1 %v1314_v2 }
  0x14   : > { %s899_s16 = sshll.u32 %s233_s15, 3  ;;  %s927_s15 = smul.u32 (%p1372_p4), 104, %s1360_s21 }
  0x15   : > { %s1410_s23 = scalar_lea.vmem %s1689_s0, %s899_s16 }
  0x16   : > { %v246_v13 = vld [vmem:[%s1410_s23] sm:$0xff]  ;;  %v247_v14 = vld [vmem:[%s1410_s23 + $0x8] sm:$0xff]  ;;  %1123 = vmatpush3.bf16.msra.mxu1 %v1096_v15  ;;  %v248_v18 = vld [vmem:[%s1410_s23 + $0x10] sm:$0xff]  ;;  %s1607_s20 = scalar_lea.vmem (%p1372_p4), %s1694_s5, %s927_s15  }
  0x17   : > { %977 = vmatmul.mubr.msk.f32.vlgmr.msra.gmra.mrb[0].mxu0 %vm268_vm1, %v246_v13  ;;  %1116 = vmatprep.subr.bf16.mxu1 %v1314_v2  ;;  %v249_v22 = vld [vmem:[%s1410_s23 + $0x18] sm:$0xff]  ;;  %v250_v26 = vld [vmem:[%s1410_s23 + $0x20] sm:$0xff]  ;;  %v251_v30 = vld [vmem:[%s1410_s23 + $0x28] sm:$0xff] }
  0x18   : > { %979 = vmatprep.mubr.msk.f32.mxu0 %vm1315_vm0, %v1316_v4  ;;  %1091 = vmatpush3.bf16.msra.mxu0 %v1090_v7  ;;  %v252_v32 = vld [vmem:[%s1410_s23 + $0x30] sm:$0xff]  ;;  %v253_v33 = vld [vmem:[%s1410_s23 + $0x38] sm:$0xff]  ;;  %v254_v34 = vld [vmem:[%s1410_s23 + $0x40] sm:$0xff] }
  0x19   : > { %1092 = vmatprep.subr.bf16.mxu0 %v1314_v2  ;;  %v255_v35 = vld [vmem:[%s1410_s23 + $0x48] sm:$0xff]  ;;  %v256_v36 = vld [vmem:[%s1410_s23 + $0x50] sm:$0xff]  ;;  %v257_v37 = vld [vmem:[%s1410_s23 + $0x58] sm:$0xff] }
  0x1a   : > { %1124 = vmatpush3.bf16.msra.mxu1 %v1099_v19  ;;  %v258_v38 = vld [vmem:[%s1410_s23 + $0x60] sm:$0xff]  ;;  %s224_s23 = sand.u32 1, %s1272_s18   ;;  %s638_s18 = ssub.s32 (%p1372_p4), 25, %s1383_s6 }
  0x1b   : > { %980 = vmatmul.mubr.msk.f32.gmra.mrb[2].mxu0 %vm268_vm1, %v247_v14  ;;  %1117 = vmatprep.subr.bf16.mxu1 %v1314_v2  ;;  %s1129_s11 = smul.u32 104, %s224_s23  ;;  %p639_p8 = scmp.lt.s32.totalorder (%p1372_p4), %s638_s18, 13 }
  0x1c   : > { %982 = vmatprep.mubr.msk.f32.mxu0 %vm1315_vm0, %v1316_v4  ;;  %1094 = vmatpush3.bf16.msra.mxu0 %v1093_v10 }
  0x1d   : > { %1095 = vmatprep.subr.bf16.mxu0 %v1314_v2  ;;  %s1560_s14 = scalar_lea.vmem [#allocation2], %s1129_s11  }
  0x1e   : > { %1125 = vmatpush3.bf16.msra.mxu1 %v1102_v23 }
  0x1f   : > { %983 = vmatmul.mubr.msk.f32.gmra.mrb[4].mxu0 %vm268_vm1, %v248_v18  ;;  %1118 = vmatprep.subr.bf16.mxu1 %v1314_v2 }
  0x20   : > { %985 = vmatprep.mubr.msk.f32.mxu0 %vm1315_vm0, %v1316_v4  ;;  %1097 = vmatpush3.bf16.msra.mxu0 %v1096_v15 }
  0x21   : > { %1098 = vmatprep.subr.bf16.mxu0 %v1314_v2 }
  0x22   : > { %1126 = vmatpush3.bf16.msra.mxu1 %v1105_v27 }
  0x23   : > { %986 = vmatmul.mubr.msk.f32.gmra.mrb[6].mxu0 %vm268_vm1, %v249_v22  ;;  %1119 = vmatprep.subr.bf16.mxu1 %v1314_v2 }
  0x24   : > { %988 = vmatprep.mubr.msk.f32.mxu0 %vm1315_vm0, %v1316_v4  ;;  %1100 = vmatpush3.bf16.msra.mxu0 %v1099_v19 }
  0x25   : > { %1101 = vmatprep.subr.bf16.mxu0 %v1314_v2 }
  0x26   : > { %1127 = vmatpush3.bf16.msra.mxu1 %v1108_v31 }
  0x27   : > { %989 = vmatmul.mubr.msk.f32.gmra.mrb[8].mxu0 %vm268_vm1, %v250_v26  ;;  %1120 = vmatprep.subr.bf16.mxu1 %v1314_v2 }
  0x28   : > { %991 = vmatprep.mubr.msk.f32.mxu0 %vm1315_vm0, %v1316_v4  ;;  %1103 = vmatpush3.bf16.msra.mxu0 %v1102_v23 }
  0x29   : > { %1104 = vmatprep.subr.bf16.mxu0 %v1314_v2 }
  0x2a   : > { %1128 = vmatpush3.bf16.msra.mxu1 %v1111_v41 }
  0x2b   : > { %992 = vmatmul.mubr.msk.f32.gmra.mrb[10].mxu0 %vm268_vm1, %v251_v30 }
  0x2c   : > { %994 = vmatprep.mubr.msk.f32.mxu0 %vm1315_vm0, %v1316_v4  ;;  %1106 = vmatpush3.bf16.msra.mxu0 %v1105_v27 }
  0x2d   : > { %1107 = vmatprep.subr.bf16.mxu0 %v1314_v2 }
  0x2f   : > { %995 = vmatmul.mubr.msk.f32.gmra.mrb[12].mxu0 %vm268_vm1, %v252_v32  ;;  %v1557_v32 = vld [vmem:[%s1693_s4] ss:$0 sm:$0xff] }
  0x30   : > { %997 = vmatprep.mubr.msk.f32.mxu0 %vm1315_vm0, %v1316_v4  ;;  %1109 = vmatpush3.bf16.msra.mxu0 %v1108_v31 }
  0x31   : > { %1110 = vmatprep.subr.bf16.mxu0 %v1314_v2 }
  0x33   : > { %998 = vmatmul.mubr.msk.f32.gmra.mrb[14].mxu0 %vm268_vm1, %v253_v33 }
  0x34   : > { %1000 = vmatprep.mubr.msk.f32.mxu0 %vm1315_vm0, %v1316_v4  ;;  %1112 = vmatpush3.bf16.msra.mxu0 %v1111_v41 }
  0x37   : > { %1001 = vmatmul.mubr.msk.f32.gmra.mrb[16].mxu0 %vm268_vm1, %v254_v34 }
  0x38   : > { %1003 = vmatprep.mubr.msk.f32.mxu0 %vm1315_vm0, %v1316_v4 }
  0x3b   : > { %1004 = vmatmul.mubr.msk.f32.gmra.mrb[18].mxu0 %vm268_vm1, %v255_v35 }
  0x3c   : > { %1006 = vmatprep.mubr.msk.f32.mxu0 %vm1315_vm0, %v1316_v4 }
  0x3f   : > { %1007 = vmatmul.mubr.msk.f32.gmra.mrb[20].mxu0 %vm268_vm1, %v256_v36 }
  0x40   : > { %1009 = vmatprep.mubr.msk.f32.mxu0 %vm1315_vm0, %v1316_v4 }
  0x43   : > { %1010 = vmatmul.mubr.msk.f32.gmra.mrb[22].mxu0 %vm268_vm1, %v257_v37 }
  0x44   : > { %1012 = vmatprep.mubr.msk.f32.mxu0 %vm1315_vm0, %v1316_v4 }
  0x47   : > { %1013 = vmatmul.mubr.msk.f32.gmra.mrb[24].mxu0 %vm268_vm1, %v258_v38 }
  0x48   : > { %1047 = vmatprep.mubr.msk.f32.mxu0 %vm1315_vm0, %v1316_v4 }
  0xea   : > { %v374_v43 = vpop.f32.mrb[0].mxu0 }
  0xeb   : > { %v375_v44 = vadd.f32 %v1516_v42, %v374_v43  ;;  %v978_v45 = vpop.f32.mrb[1].mxu0 }
  0xed   : > { %v438_v46 = vmax.f32 %v375_v44, 0.0 }
  0xee   : > { %v379_v47 = vpop.f32.mrb[2].mxu0 }
  0xef   : > { %v380_v48 = vadd.f32 %v1516_v42, %v379_v47  ;;  %v981_v49 = vpop.f32.mrb[3].mxu0  ;;  %1048 = vmatmul.mubr.f32.vlgmr.msra.gmra.mrb[26].mxu0 %v438_v46 }
  0xf0   : > { %1050 = vmatprep.mubr.msk.f32.mxu0 %vm1315_vm0, %v1316_v4 }
  0xf1   : > { %v439_v50 = vmax.f32 %v380_v48, 0.0 }
  0xf2   : > { %v384_v51 = vpop.f32.mrb[4].mxu0 }
  0xf3   : > { %v385_v52 = vadd.f32 %v1516_v42, %v384_v51  ;;  %v984_v53 = vpop.f32.mrb[5].mxu0  ;;  %1051 = vmatmul.mubr.f32.gmra.mrb[28].mxu0 %v439_v50 }
  0xf4   : > { %1053 = vmatprep.mubr.msk.f32.mxu0 %vm1315_vm0, %v1316_v4 }
  0xf5   : > { %v440_v54 = vmax.f32 %v385_v52, 0.0 }
  0xf6   : > { %v389_v55 = vpop.f32.mrb[6].mxu0 }
  0xf7   : > { %v390_v56 = vadd.f32 %v1516_v42, %v389_v55  ;;  %v987_v57 = vpop.f32.mrb[7].mxu0  ;;  %1054 = vmatmul.mubr.f32.gmra.mrb[30].mxu0 %v440_v54 }
  0xf9   : > { %v441_v58 = vmax.f32 %v390_v56, 0.0 }
  0xfa   : > { %v394_v59 = vpop.f32.mrb[8].mxu0 }
  0xfb   : > { %v395_v60 = vadd.f32 %v1516_v42, %v394_v59  ;;  %v990_v61 = vpop.f32.mrb[9].mxu0  ;;  %1057 = vmatmul.mubr.f32.vlgmr.msra.gmra.mrb[0].mxu1 %v441_v58 }
  0xfc   : > { %1059 = vmatprep.mubr.msk.f32.mxu1 %vm1315_vm0, %v1316_v4 }
  0xfd   : > { %v442_v62 = vmax.f32 %v395_v60, 0.0 }
  0xfe   : > { %v399_v63 = vpop.f32.mrb[10].mxu0 }
  0xff   : > { %v400_v0 = vadd.f32 %v1516_v42, %v399_v63  ;;  %v993_v1 = vpop.f32.mrb[11].mxu0  ;;  %1060 = vmatmul.mubr.f32.gmra.mrb[2].mxu1 %v442_v62 }
 0x100   : > { %1062 = vmatprep.mubr.msk.f32.mxu1 %vm1315_vm0, %v1316_v4 }
 0x101   : > { %v443_v2 = vmax.f32 %v400_v0, 0.0 }
 0x102   : > { %v404_v3 = vpop.f32.mrb[12].mxu0 }
 0x103   : > { %v405_v5 = vadd.f32 %v1516_v42, %v404_v3  ;;  %v996_v6 = vpop.f32.mrb[13].mxu0  ;;  %1063 = vmatmul.mubr.f32.gmra.mrb[4].mxu1 %v443_v2 }
 0x104   : > { %1065 = vmatprep.mubr.msk.f32.mxu1 %vm1315_vm0, %v1316_v4 }
 0x105   : > { %v444_v7 = vmax.f32 %v405_v5, 0.0 }
 0x106   : > { %v409_v8 = vpop.f32.mrb[14].mxu0 }
 0x107   : > { %v410_v9 = vadd.f32 %v1516_v42, %v409_v8  ;;  %v999_v10 = vpop.f32.mrb[15].mxu0  ;;  %1066 = vmatmul.mubr.f32.gmra.mrb[6].mxu1 %v444_v7 }
 0x108   : > { %1068 = vmatprep.mubr.msk.f32.mxu1 %vm1315_vm0, %v1316_v4 }
 0x109   : > { %v445_v11 = vmax.f32 %v410_v9, 0.0 }
 0x10a   : > { %v414_v12 = vpop.f32.mrb[16].mxu0 }
 0x10b   : > { %v415_v13 = vadd.f32 %v1516_v42, %v414_v12  ;;  %v1002_v14 = vpop.f32.mrb[17].mxu0  ;;  %1069 = vmatmul.mubr.f32.gmra.mrb[8].mxu1 %v445_v11 }
 0x10c   : > { %1071 = vmatprep.mubr.msk.f32.mxu1 %vm1315_vm0, %v1316_v4 }
 0x10d   : > { %v446_v15 = vmax.f32 %v415_v13, 0.0 }
 0x10e   : > { %v419_v16 = vpop.f32.mrb[18].mxu0 }
 0x10f   : > { %v420_v17 = vadd.f32 %v1516_v42, %v419_v16  ;;  %v1005_v18 = vpop.f32.mrb[19].mxu0  ;;  %1072 = vmatmul.mubr.f32.gmra.mrb[10].mxu1 %v446_v15 }
 0x110   : > { %1074 = vmatprep.mubr.msk.f32.mxu1 %vm1315_vm0, %v1316_v4 }
 0x111   : > { %v447_v19 = vmax.f32 %v420_v17, 0.0 }
 0x112   : > { %v424_v20 = vpop.f32.mrb[20].mxu0 }
 0x113   : > { %v425_v21 = vadd.f32 %v1516_v42, %v424_v20  ;;  %v1008_v22 = vpop.f32.mrb[21].mxu0  ;;  %1075 = vmatmul.mubr.f32.gmra.mrb[12].mxu1 %v447_v19 }
 0x114   : > { %1077 = vmatprep.mubr.msk.f32.mxu1 %vm1315_vm0, %v1316_v4 }
 0x115   : > { %v448_v23 = vmax.f32 %v425_v21, 0.0 }
 0x116   : > { %v429_v24 = vpop.f32.mrb[22].mxu0 }
 0x117   : > { %v430_v25 = vadd.f32 %v1516_v42, %v429_v24  ;;  %v1011_v26 = vpop.f32.mrb[23].mxu0  ;;  %1078 = vmatmul.mubr.f32.gmra.mrb[14].mxu1 %v448_v23 }
 0x118   : > { %1080 = vmatprep.mubr.msk.f32.mxu1 %vm1315_vm0, %v1316_v4 }
 0x119   : > { %v449_v27 = vmax.f32 %v430_v25, 0.0 }
 0x11a   : > { %v434_v28 = vpop.f32.mrb[24].mxu0 }
 0x11b   : > { %v435_v29 = vadd.f32 %v1516_v42, %v434_v28  ;;  %v1014_v30 = vpop.f32.mrb[25].mxu0  ;;  %1081 = vmatmul.mubr.f32.gmra.mrb[16].mxu1 %v449_v27 }
 0x11c   : > { %1083 = vmatprep.mubr.msk.f32.mxu1 %vm1315_vm0, %v1316_v4 }
 0x11d   : > { %v450_v31 = vmax.f32 %v435_v29, 0.0 }
 0x11f   : > { %1084 = vmatmul.mubr.f32.gmra.mrb[18].mxu1 %v450_v31 }
 0x1c2   : > { %v540_v33 = vpop.f32.mrb[26].mxu0 }
 0x1c3   : > { %v541_v34 = vadd.f32 %v1557_v32, %v540_v33  ;;  %v1049_v35 = vpop.f32.mrb[27].mxu0 }
 0x1c5   : > { %v604_v36 = vmax.f32 %v541_v34, 0.0 }
 0x1c6   : > { %v545_v37 = vpop.f32.mrb[28].mxu0 }
 0x1c7   : > { %617 = vst.msk [vmem:[%s1560_s14] sm:$0xff] %vm268_vm1, %v604_v36  ;;  %v546_v4 = vadd.f32 %v1557_v32, %v545_v37  ;;  %v1052_v38 = vpop.f32.mrb[29].mxu0 }
 0x1c9   : > { %v605_v39 = vmax.f32 %v546_v4, 0.0 }
 0x1ca   : > { %v550_v40 = vpop.f32.mrb[30].mxu0 }
 0x1cb   : > { %618 = vst.msk [vmem:[%s1560_s14 + $0x8] sm:$0xff] %vm268_vm1, %v605_v39  ;;  %v551_v41 = vadd.f32 %v1557_v32, %v550_v40  ;;  %v1055_v42 = vpop.f32.mrb[31].mxu0 }
 0x1cd   : > { %v606_v43 = vmax.f32 %v551_v41, 0.0 }
 0x1ce   : > { %v555_v44 = vpop.f32.mrb[0].mxu1 }
 0x1cf   : > { %619 = vst.msk [vmem:[%s1560_s14 + $0x10] sm:$0xff] %vm268_vm1, %v606_v43  ;;  %v556_v45 = vadd.f32 %v1557_v32, %v555_v44  ;;  %v1058_v46 = vpop.f32.mrb[1].mxu1 }
 0x1d1   : > { %v607_v47 = vmax.f32 %v556_v45, 0.0 }
 0x1d2   : > { %v560_v48 = vpop.f32.mrb[2].mxu1 }
 0x1d3   : > { %620 = vst.msk [vmem:[%s1560_s14 + $0x18] sm:$0xff] %vm268_vm1, %v607_v47  ;;  %v561_v49 = vadd.f32 %v1557_v32, %v560_v48  ;;  %v1061_v50 = vpop.f32.mrb[3].mxu1 }
 0x1d5   : > { %v608_v51 = vmax.f32 %v561_v49, 0.0 }
 0x1d6   : > { %v565_v52 = vpop.f32.mrb[4].mxu1 }
 0x1d7   : > { %621 = vst.msk [vmem:[%s1560_s14 + $0x20] sm:$0xff] %vm268_vm1, %v608_v51  ;;  %v566_v53 = vadd.f32 %v1557_v32, %v565_v52  ;;  %v1064_v54 = vpop.f32.mrb[5].mxu1 }
 0x1d9   : > { %v609_v55 = vmax.f32 %v566_v53, 0.0 }
 0x1da   : > { %v570_v56 = vpop.f32.mrb[6].mxu1 }
 0x1db   : > { %622 = vst.msk [vmem:[%s1560_s14 + $0x28] sm:$0xff] %vm268_vm1, %v609_v55  ;;  %v571_v57 = vadd.f32 %v1557_v32, %v570_v56  ;;  %v1067_v58 = vpop.f32.mrb[7].mxu1 }
 0x1dd   : > { %v610_v59 = vmax.f32 %v571_v57, 0.0 }
 0x1de   : > { %v575_v60 = vpop.f32.mrb[8].mxu1 }
 0x1df   : > { %623 = vst.msk [vmem:[%s1560_s14 + $0x30] sm:$0xff] %vm268_vm1, %v610_v59  ;;  %v576_v61 = vadd.f32 %v1557_v32, %v575_v60  ;;  %v1070_v62 = vpop.f32.mrb[9].mxu1 }
 0x1e1   : > { %v611_v63 = vmax.f32 %v576_v61, 0.0 }
 0x1e2   : > { %v580_v0 = vpop.f32.mrb[10].mxu1 }
 0x1e3   : > { %624 = vst.msk [vmem:[%s1560_s14 + $0x38] sm:$0xff] %vm268_vm1, %v611_v63  ;;  %v581_v1 = vadd.f32 %v1557_v32, %v580_v0  ;;  %v1073_v2 = vpop.f32.mrb[11].mxu1 }
 0x1e5   : > { %v612_v3 = vmax.f32 %v581_v1, 0.0 }
 0x1e6   : > { %v585_v5 = vpop.f32.mrb[12].mxu1 }
 0x1e7   : > { %625 = vst.msk [vmem:[%s1560_s14 + $0x40] sm:$0xff] %vm268_vm1, %v612_v3  ;;  %v586_v6 = vadd.f32 %v1557_v32, %v585_v5  ;;  %v1076_v7 = vpop.f32.mrb[13].mxu1 }
 0x1e9   : > { %v613_v8 = vmax.f32 %v586_v6, 0.0 }
 0x1ea   : > { %v590_v9 = vpop.f32.mrb[14].mxu1 }
 0x1eb   : > { %626 = vst.msk [vmem:[%s1560_s14 + $0x48] sm:$0xff] %vm268_vm1, %v613_v8  ;;  %v591_v10 = vadd.f32 %v1557_v32, %v590_v9  ;;  %v1079_v11 = vpop.f32.mrb[15].mxu1 }
 0x1ed   : > { %v614_v12 = vmax.f32 %v591_v10, 0.0 }
 0x1ee   : > { %v595_v13 = vpop.f32.mrb[16].mxu1 }
 0x1ef   : > { %627 = vst.msk [vmem:[%s1560_s14 + $0x50] sm:$0xff] %vm268_vm1, %v614_v12  ;;  %v596_v14 = vadd.f32 %v1557_v32, %v595_v13  ;;  %v1082_v15 = vpop.f32.mrb[17].mxu1 }
 0x1f1   : > { %v615_v16 = vmax.f32 %v596_v14, 0.0  ;;  %636 = sbr.rel (!%p1372_p4) target bundleno = 565 (0x235), region = 44 }
 0x1f2   : > { %v600_v17 = vpop.f32.mrb[18].mxu1 }
 0x1f3   : > { %628 = vst.msk [vmem:[%s1560_s14 + $0x58] sm:$0xff] %vm268_vm1, %v615_v16  ;;  %v601_v18 = vadd.f32 %v1557_v32, %v600_v17  ;;  %v1085_v19 = vpop.f32.mrb[19].mxu1 }
 0x1f5   : > { %v616_v20 = vmax.f32 %v601_v18, 0.0 }
 0x1f7   : > { %629 = vst.msk [vmem:[%s1560_s14 + $0x60] sm:$0xff] %vm268_vm1, %v616_v20 }
 0x1f8   : > { %s1703_s18 = smov (!%p639_p8, %s638_s18), 13 }
 0x1f9   : > { %s915_s24 = sshll.u32 %s1703_s18, 7 }
 0x1fa   : > { %p918_p9 = scmp.eq.s32.totalorder %s915_s24, 0 }
 0x1fb   : > { %1222 = sdivrem.u32 (!%p918_p9), %s1703_s18, 13 }
 0x1fc   : > { %647 = sbr.rel (%p918_p9) target bundleno = 565 (0x235), region = 48 }
 0x204   : > { %s1613_s26 = spop.drf %1222 }
 0x205   : > { %p919_p10 = scmp.le.s32.totalorder %s1613_s26, 0 }
 0x206   : > { %s1696_s21 = smov (!%p919_p10), %s1607_s20  ;;  %s1697_s6 = smov (!%p919_p10), %s1560_s14 }
 0x207   : > { %851 = sbr.rel (%p919_p10) target bundleno = 536 (0x218), region = 124  ;;  %s1622_s27 = smov (!%p919_p10), 0  }
 0x208   : > { %s1624_s28 = smov (!%p919_p10), 0  }
 0x20e LB: >> { %v735_v21 = vld [vmem:[%s1288_s6] sm:$0xff]  ;;  %v737_v22 = vld [vmem:[%s1288_s6 + $0x8] sm:$0xff]  ;;  %v739_v23 = vld [vmem:[%s1288_s6 + $0x10] sm:$0xff]  ;;  %s761_s29 = sadd.s32 1, %s1292_s27  ;;  %s729_s28 = sadd.s32 1, %s1296_s28   ;;  %s1296_s28 = sphi %s1624_s28, %s729_s28   ;;  %s1292_s27 = sphi %s1622_s27, %s1698_s27   ;;  %s1288_s6 = sphi %s1697_s6, %s766_s6   ;;  %s1284_s21 = sphi %s1696_s21, %s767_s21  }
 0x20f   : >> { %736 = vst [vmem:[%s1284_s21] sm:$0xff] %v735_v21  ;;  %738 = vst [vmem:[%s1284_s21 + $0x8] sm:$0xff] %v737_v22  ;;  %v741_v24 = vld [vmem:[%s1288_s6 + $0x18] sm:$0xff]  ;;  %v743_v25 = vld [vmem:[%s1288_s6 + $0x20] sm:$0xff]  ;;  %p762_p11 = scmp.ge.s32.totalorder %s761_s29, %s1613_s26  ;;  %p728_p12 = scmp.ge.s32.totalorder %s729_s28, %s1613_s26 }
 0x210   : >> { %740 = vst [vmem:[%s1284_s21 + $0x10] sm:$0xff] %v739_v23  ;;  %v745_v26 = vld [vmem:[%s1288_s6 + $0x28] sm:$0xff]  ;;  %742 = vst [vmem:[%s1284_s21 + $0x18] sm:$0xff] %v741_v24  ;;  %v747_v27 = vld [vmem:[%s1288_s6 + $0x30] sm:$0xff] }
 0x211   : >> { %744 = vst [vmem:[%s1284_s21 + $0x20] sm:$0xff] %v743_v25  ;;  %746 = vst [vmem:[%s1284_s21 + $0x28] sm:$0xff] %v745_v26  ;;  %v749_v28 = vld [vmem:[%s1288_s6 + $0x38] sm:$0xff]  ;;  %v751_v29 = vld [vmem:[%s1288_s6 + $0x40] sm:$0xff]  ;;  %s1705_s29 = smov (%p762_p11, %s761_s29), 0  ;;  %731 = sbr.rel (!%p728_p12) target bundleno = 526 (0x20e), region = 130 }
 0x212   : >> { %748 = vst [vmem:[%s1284_s21 + $0x30] sm:$0xff] %v747_v27  ;;  %750 = vst [vmem:[%s1284_s21 + $0x38] sm:$0xff] %v749_v28  ;;  %v753_v30 = vld [vmem:[%s1288_s6 + $0x48] sm:$0xff]  ;;  %v755_v31 = vld [vmem:[%s1288_s6 + $0x50] sm:$0xff]  ;;  %s764_s30 = smul.u32 104, %s1705_s29  ;;  %s1698_s27 = smov %s1705_s29 }
 0x213   : >> { %752 = vst [vmem:[%s1284_s21 + $0x40] sm:$0xff] %v751_v29  ;;  %v757_v32 = vld [vmem:[%s1288_s6 + $0x58] sm:$0xff]  ;;  %754 = vst [vmem:[%s1284_s21 + $0x48] sm:$0xff] %v753_v30  ;;  %v759_v33 = vld [vmem:[%s1288_s6 + $0x60] sm:$0xff] }
 0x214   : >> { %756 = vst [vmem:[%s1284_s21 + $0x50] sm:$0xff] %v755_v31  ;;  %758 = vst [vmem:[%s1284_s21 + $0x58] sm:$0xff] %v757_v32  ;;  %s766_s6 = scalar_lea.vmem %s1560_s14, %s764_s30 [#allocation2]  }
 0x215   : >> { %760 = vst [vmem:[%s1284_s21 + $0x60] sm:$0xff] %v759_v33  ;;  %s767_s21 = scalar_lea.vmem %s1607_s20, %s764_s30  }
 0x218 PF: > { %1224 = sdivrem.u32 %s1703_s18, 13 }
 0x219   : > { %s920_s7 = smul.u32 104, %s1613_s26 }
 0x21b   : > { %s772_s8 = scalar_lea.vmem %s1560_s14, %s920_s7 [#allocation2]   ;;  %s774_s9 = scalar_lea.vmem %s1607_s20, %s920_s7  }
 0x221   : > { %s1225_s10 = spop.drf %1224 }
 0x222   : > { %p922_p13 = scmp.le.s32.totalorder %s1225_s10, 0 }
 0x223   : > { %s1298_s23 = smov (!%p922_p13), %s774_s9   ;;  %s1302_s11 = smov (!%p922_p13), %s772_s8  }
 0x224   : > { %865 = sbr.rel (%p922_p13) target bundleno = 565 (0x235), region = 135  ;;  %s1306_s12 = smov (!%p922_p13), 0  }
 0x225   : > { %s1310_s13 = smov (!%p922_p13), 0  }
 0x22b LB: >> { %v784_v34 = vld [vmem:[%s1304_s11] sm:$0xff]  ;;  %s786_s15 = sadd.s32 1, %s1308_s12  ;;  %s778_s13 = sadd.s32 1, %s1312_s13   ;;  %s1312_s13 = sphi %s1310_s13, %s778_s13   ;;  %s1308_s12 = sphi %s1306_s12, %s1307_s12   ;;  %s1304_s11 = sphi %s1302_s11, %s791_s11   ;;  %s1300_s23 = sphi %s1298_s23, %s792_s23  }
 0x22c   : >> { %785 = vst [vmem:[%s1300_s23] sm:$0xff] %v784_v34  ;;  %p787_p0 = scmp.ge.s32.totalorder %s786_s15, %s1225_s10  ;;  %p777_p1 = scmp.ge.s32.totalorder %s778_s13, %s1225_s10 }
 0x22e   : >> { %s1707_s15 = smov (%p787_p0, %s786_s15), 0  ;;  %780 = sbr.rel (!%p777_p1) target bundleno = 555 (0x22b), region = 141 }
 0x22f   : >> { %s923_s14 = sshll.u32 %s1707_s15, 3  ;;  %s1307_s12 = smov %s1707_s15  }
 0x230   : >> { %s791_s11 = scalar_lea.vmem %s772_s8, %s923_s14 [#allocation2]   ;;  %s792_s23 = scalar_lea.vmem %s774_s9, %s923_s14  }
 0x235 PF: > { %p12_p2 = scmp.ge.s32.totalorder %s1362_s22, 4   ;;  %s1699_s18 = smov %s1276_s19 }
 0x236   : > { %s1700_s19 = smov %s1370_s25  ;;  %s1701_s20 = smov %s1362_s22 }
 0x237   :  { %14 = sbr.rel (!%p12_p2) target bundleno = 2 (0x2), region = 152 }

</bundles_post_ra>
